<compile_context>
chip_gen: v7x
topology: tpu7x:2x2x1
jax: 0.10.0
libtpu: 0.0.40
codegen_flags: <defaults>
</compile_context>

<pallas_src>
import functools

import jax
import jax.numpy as jnp
import numpy as np
from jax.experimental import pallas as pl
from jax.experimental.pallas import tpu as pltpu


def _dice_kernel(out_ref, tgt_ref, inter_ref, denom_ref, *, chunk_r):
    """Accumulate per-class intersection / denominator partial sums.

    out_ref:   (C, tile_r, 128)   class probabilities
    tgt_ref:   (tile_r, 128)      int32 labels (-100 = ignore)
    inter_ref: (C, chunk_r, 128)  per-lane intersection accumulator (output, resident)
    denom_ref: (C, chunk_r, 128)  per-lane denominator accumulator (output, resident)
    """
    # First visit of this split's accumulator block -> zero it.
    @pl.when(jnp.logical_and(pl.program_id(1) == 0, pl.program_id(2) == 0))
    def _():
        inter_ref[...] = jnp.zeros_like(inter_ref)
        denom_ref[...] = jnp.zeros_like(denom_ref)

    C, tile_r, lane = out_ref.shape
    n_chunks = tile_r // chunk_r
    cls = jax.lax.broadcasted_iota(jnp.int32, (C, 1, 1), 0)  # class id per outer row

    def chunk_body(j, carry):
        inter, denom = carry
        r0 = pl.multiple_of(j * chunk_r, chunk_r)
        o = out_ref[:, pl.ds(r0, chunk_r), :].astype(jnp.float32)   # (C, chunk_r, 128)
        t = tgt_ref[pl.ds(r0, chunk_r), :][None, :, :]              # (1, chunk_r, 128)
        cmask = t == cls                                            # (C, chunk_r, 128)
        # target == -100 never equals a class in [0, C), so cmask already implies "valid".
        valid = (t != -100).astype(jnp.float32)                     # (1, chunk_r, 128)
        inter = inter + jnp.where(cmask, o, 0.0)
        denom = denom + cmask.astype(jnp.float32) + o * valid
        return inter, denom

    zeros = jnp.zeros((C, chunk_r, lane), jnp.float32)
    if n_chunks == 1:
        inter, denom = chunk_body(jnp.int32(0), (zeros, zeros))
    else:
        inter, denom = jax.lax.fori_loop(0, n_chunks, chunk_body, (zeros, zeros),
                                         unroll=min(8, n_chunks))
    inter_ref[...] += inter
    denom_ref[...] += denom


def dice_loss(output, target, weight=None, smooth=1e-7,
              vmem_block_budget=8 * 1024 * 1024):
    """output: (N, C, H, W) float probs, target: (N, H, W) int labels (-100 = ignore)."""
    N, C, H, W = output.shape
    HW = H * W
    LANE = 128

    if weight is None:
        weight = jnp.ones((C,), jnp.float32)
    weight = (weight / weight.sum()).astype(jnp.float32)

    # Keep bf16 inputs as-is (halves the dominant HBM read stream); else compute in f32.
    if output.dtype not in (jnp.float32, jnp.bfloat16):
        output = output.astype(jnp.float32)
    o_bytes = output.dtype.itemsize
    SUB = 8 * (4 // o_bytes)                 # sublane packing: 8 rows f32, 16 rows bf16

    # ---- tile selection: pixels -> (rows, 128 lanes); rows tiled by tile_r ----
    R0 = pl.cdiv(HW, LANE)
    bytes_per_row = (C * o_bytes + 4) * LANE                 # probs + int32 target per row
    cap_r = max(SUB, (vmem_block_budget // (2 * bytes_per_row)) // SUB * SUB)

    if R0 < SUB:
        tile_r = chunk_r = R0                                # tiny input: one sub-vreg tile
        R_pad = R0
    else:
        R_al = pl.cdiv(R0, SUB) * SUB                        # sublane-aligned row count
        chunk_r = SUB
        if R_al <= cap_r:
            tile_r = R_al
        else:
            tile_r = 0
            d = cap_r
            while d >= SUB:                                  # largest divisor -> no padding
                if R_al % d == 0:
                    tile_r = d
                    break
                d -= SUB
            if tile_r < max(SUB, cap_r // 8):                # divisor too small -> pad instead
                tile_r = cap_r
        R_pad = pl.cdiv(R_al, tile_r) * tile_r

    HW_pad = R_pad * LANE
    out_flat = output.reshape(N, C, HW)                      # free reshapes, no transpose
    tgt_flat = target.reshape(N, HW).astype(jnp.int32)
    if HW_pad != HW:
        # Padded pixels get target=-100, so the kernel ignores them.
        out_flat = jnp.pad(out_flat, ((0, 0), (0, 0), (0, HW_pad - HW)))
        tgt_flat = jnp.pad(tgt_flat, ((0, 0), (0, HW_pad - HW)), constant_values=-100)
    out_r = out_flat.reshape(N, C, R_pad, LANE)
    tgt_r = tgt_flat.reshape(N, R_pad, LANE)

    # ---- grid: (split, image, row-tile); split feeds v7x's two TensorCores ----
    T = R_pad // tile_r
    if N % 2 == 0:
        split, n_per, t_per, split_n = 2, N // 2, T, True
    elif T % 2 == 0:
        split, n_per, t_per, split_n = 2, N, T // 2, False
    else:
        split, n_per, t_per, split_n = 1, N, T, False

    if split_n:
        out_map = lambda s, i, t: (s * n_per + i, 0, t, 0)
        tgt_map = lambda s, i, t: (s * n_per + i, t, 0)
    else:
        out_map = lambda s, i, t: (i, 0, s * t_per + t, 0)
        tgt_map = lambda s, i, t: (i, s * t_per + t, 0)
    acc_map = lambda s, i, t: (s, 0, 0, 0)

    acc_shape = jax.ShapeDtypeStruct((split, C, chunk_r, LANE), jnp.float32)
    acc_spec = pl.BlockSpec((None, C, chunk_r, LANE), acc_map)

    inter_p, denom_p = pl.pallas_call(
        functools.partial(_dice_kernel, chunk_r=chunk_r),
        out_shape=[acc_shape, acc_shape],
        grid_spec=pltpu.PrefetchScalarGridSpec(
            num_scalar_prefetch=0,
            grid=(split, n_per, t_per),
            in_specs=[
                pl.BlockSpec((None, C, tile_r, LANE), out_map),   # probabilities tile
                pl.BlockSpec((None, tile_r, LANE), tgt_map),      # labels tile
            ],
            out_specs=[acc_spec, acc_spec],
        ),
        compiler_params=pltpu.CompilerParams(
            dimension_semantics=("parallel", "arbitrary", "arbitrary"),
            vmem_limit_bytes=32 * 1024 * 1024,
        ),
    )(out_r, tgt_r)

    # Tiny epilogue in plain XLA: reduce per-lane partials, combine per class.
    inter_c = inter_p.sum(axis=(0, 2, 3))                    # (C,)
    denom_c = denom_p.sum(axis=(0, 2, 3))                    # (C,)
    class_loss = 1.0 - (2.0 * inter_c + smooth) / (denom_c + smooth)
    return jnp.sum(class_loss * weight)


def dice_loss_ref(output, target, weight, smooth=1e-7):
    """Pure-JAX reference mirroring the PyTorch forward (static classes 0..C-1)."""
    C = output.shape[1]
    w = weight / weight.sum()
    valid = target != -100
    loss = jnp.float32(0.0)
    for c in range(C):
        cmask = target == c
        inter = jnp.sum(jnp.where(valid, cmask * output[:, c], 0.0))
        denom = jnp.sum(jnp.where(valid, cmask.astype(jnp.float32) + output[:, c], 0.0))
        loss += (1.0 - (2.0 * inter + smooth) / (denom + smooth)) * w[c]
    return loss


if __name__ == "__main__":
    N, C, H, W = 2, 4, 16, 16
    key = jax.random.PRNGKey(0)
    k_out, k_tgt, k_ign = jax.random.split(key, 3)

    logits = jax.random.normal(k_out, (N, C, H, W), jnp.float32)
    output = jax.nn.softmax(logits, axis=1)                        # per-pixel class probs
    target = jax.random.randint(k_tgt, (N, H, W), 0, C, jnp.int32)
    ignore = jax.random.uniform(k_ign, (N, H, W)) < 0.1            # ~10% ignored pixels
    target = jnp.where(ignore, jnp.int32(-100), target)

    weight = jnp.ones((C,), jnp.float32)                           # deterministic class weights

    loss = jax.block_until_ready(dice_loss(output, target, weight))
    ref = jax.block_until_ready(dice_loss_ref(output, target, weight))

    np.testing.assert_allclose(np.asarray(loss), np.asarray(ref), rtol=1e-5, atol=1e-6)
    print("KERNEL_OK")
</pallas_src>

<mosaic_0001>
module attributes {stable_mosaic.version = 11 : i64} {
  func.func @_dice_kernel(%arg0: i32, %arg1: i32, %arg2: i32, %arg3: memref<1x4x2x128xf32, #tpu.memory_space<vmem>>, %arg4: memref<1x2x128xi32, #tpu.memory_space<vmem>>, %arg5: memref<1x4x2x128xf32, #tpu.memory_space<vmem>>, %arg6: memref<1x4x2x128xf32, #tpu.memory_space<vmem>>) attributes {dimension_semantics = [#tpu.dimension_semantics<parallel>, #tpu.dimension_semantics<arbitrary>, #tpu.dimension_semantics<arbitrary>], iteration_bounds = array<i64: 2, 1, 1>, scalar_prefetch = 0 : i64, scratch_operands = 0 : i64, tpu.core_type = #tpu.core_type<tc>, window_params = [{transform_indices = @transform_0, window_bounds = array<i64: 1, 4, 2, 128>}, {transform_indices = @transform_1, window_bounds = array<i64: 1, 2, 128>}, {transform_indices = @transform_2, window_bounds = array<i64: 1, 4, 2, 128>}, {transform_indices = @transform_3, window_bounds = array<i64: 1, 4, 2, 128>}]} {
    %c0_i32 = arith.constant 0 : i32
    %0 = arith.cmpi eq, %arg1, %c0_i32 : i32
    %c0_i32_0 = arith.constant 0 : i32
    %1 = arith.cmpi eq, %arg2, %c0_i32_0 : i32
    %2 = arith.andi %0, %1 : i1
    %3 = arith.extui %2 : i1 to i32
    %c0_i32_1 = arith.constant 0 : i32
    %4 = arith.cmpi ne, %3, %c0_i32_1 : i32
    scf.if %4 {
      %cst_24 = arith.constant 0.000000e+00 : f32
      %44 = vector.broadcast %cst_24 : f32 to vector<4x2x128xf32>
      %c0_25 = arith.constant 0 : index
      %c0_26 = arith.constant 0 : index
      %c0_27 = arith.constant 0 : index
      %c0_28 = arith.constant 0 : index
      %45 = vector.load %arg5[%c0_25, %c0_26, %c0_27, %c0_28] : memref<1x4x2x128xf32, #tpu.memory_space<vmem>>, vector<1x4x2x128xf32>
      %46 = vector.shape_cast %45 : vector<1x4x2x128xf32> to vector<4x2x128xf32>
      %47 = vector.shape_cast %44 : vector<4x2x128xf32> to vector<1x4x2x128xf32>
      tpu.vector_store %arg5[%c0_25, %c0_26, %c0_27, %c0_28], %47 {strides = array<i32>} : memref<1x4x2x128xf32, #tpu.memory_space<vmem>>, vector<1x4x2x128xf32>,
      %cst_29 = arith.constant 0.000000e+00 : f32
      %48 = vector.broadcast %cst_29 : f32 to vector<4x2x128xf32>
      %c0_30 = arith.constant 0 : index
      %c0_31 = arith.constant 0 : index
      %c0_32 = arith.constant 0 : index
      %c0_33 = arith.constant 0 : index
      %49 = vector.load %arg6[%c0_30, %c0_31, %c0_32, %c0_33] : memref<1x4x2x128xf32, #tpu.memory_space<vmem>>, vector<1x4x2x128xf32>
      %50 = vector.shape_cast %49 : vector<1x4x2x128xf32> to vector<4x2x128xf32>
      %51 = vector.shape_cast %48 : vector<4x2x128xf32> to vector<1x4x2x128xf32>
      tpu.vector_store %arg6[%c0_30, %c0_31, %c0_32, %c0_33], %51 {strides = array<i32>} : memref<1x4x2x128xf32, #tpu.memory_space<vmem>>, vector<1x4x2x128xf32>,
    } else {
    }
    %5 = tpu.iota {dimensions = array<i32: 0>} : vector<4x1x1xi32>
    %cst = arith.constant 0.000000e+00 : f32
    %6 = vector.broadcast %cst : f32 to vector<4x2x128xf32>
    %c0_i32_2 = arith.constant 0 : i32
    %c2_i32 = arith.constant 2 : i32
    %7 = arith.muli %c0_i32_2, %c2_i32 : i32
    %8 = tpu.assume_multiple %7, 2 : i32
    %c0 = arith.constant 0 : index
    %c0_3 = arith.constant 0 : index
    %9 = arith.index_cast %8 : i32 to index
    %c0_4 = arith.constant 0 : index
    %10 = vector.load %arg3[%c0, %c0_3, %9, %c0_4] : memref<1x4x2x128xf32, #tpu.memory_space<vmem>>, vector<1x4x2x128xf32>
    %11 = vector.shape_cast %10 : vector<1x4x2x128xf32> to vector<4x2x128xf32>
    %c0_5 = arith.constant 0 : index
    %12 = arith.index_cast %8 : i32 to index
    %c0_6 = arith.constant 0 : index
    %13 = vector.load %arg4[%c0_5, %12, %c0_6] : memref<1x2x128xi32, #tpu.memory_space<vmem>>, vector<1x2x128xi32>
    %14 = vector.shape_cast %13 : vector<1x2x128xi32> to vector<2x128xi32>
    %15 = vector.shape_cast %14 : vector<2x128xi32> to vector<1x2x128xi32>
    %16 = vector.broadcast %15 : vector<1x2x128xi32> to vector<4x2x128xi32>
    %17 = vector.broadcast %5 : vector<4x1x1xi32> to vector<4x2x128xi32>
    %18 = arith.cmpi eq, %16, %17 : vector<4x2x128xi32>
    %c-100_i32 = arith.constant -100 : i32
    %19 = vector.broadcast %c-100_i32 : i32 to vector<1x2x128xi32>
    %20 = arith.cmpi ne, %15, %19 : vector<1x2x128xi32>
    %21 = arith.extui %20 : vector<1x2x128xi1> to vector<1x2x128xi32>
    %22 = arith.sitofp %21 : vector<1x2x128xi32> to vector<1x2x128xf32>
    %cst_7 = arith.constant 0.000000e+00 : f32
    %23 = vector.broadcast %cst_7 : f32 to vector<4x2x128xf32>
    %24 = arith.select %18, %11, %23 : vector<4x2x128xi1>, vector<4x2x128xf32>
    %25 = arith.addf %6, %24 : vector<4x2x128xf32>
    %26 = arith.extui %18 : vector<4x2x128xi1> to vector<4x2x128xi32>
    %27 = arith.sitofp %26 : vector<4x2x128xi32> to vector<4x2x128xf32>
    %28 = arith.addf %6, %27 : vector<4x2x128xf32>
    %29 = vector.broadcast %22 : vector<1x2x128xf32> to vector<4x2x128xf32>
    %30 = arith.mulf %11, %29 : vector<4x2x128xf32>
    %31 = arith.addf %28, %30 : vector<4x2x128xf32>
    %c0_8 = arith.constant 0 : index
    %c0_9 = arith.constant 0 : index
    %c0_10 = arith.constant 0 : index
    %c0_11 = arith.constant 0 : index
    %32 = vector.load %arg5[%c0_8, %c0_9, %c0_10, %c0_11] : memref<1x4x2x128xf32, #tpu.memory_space<vmem>>, vector<1x4x2x128xf32>
    %33 = vector.shape_cast %32 : vector<1x4x2x128xf32> to vector<4x2x128xf32>
    %34 = arith.addf %33, %25 : vector<4x2x128xf32>
    %c0_12 = arith.constant 0 : index
    %c0_13 = arith.constant 0 : index
    %c0_14 = arith.constant 0 : index
    %c0_15 = arith.constant 0 : index
    %35 = vector.load %arg5[%c0_12, %c0_13, %c0_14, %c0_15] : memref<1x4x2x128xf32, #tpu.memory_space<vmem>>, vector<1x4x2x128xf32>
    %36 = vector.shape_cast %35 : vector<1x4x2x128xf32> to vector<4x2x128xf32>
    %37 = vector.shape_cast %34 : vector<4x2x128xf32> to vector<1x4x2x128xf32>
    tpu.vector_store %arg5[%c0_12, %c0_13, %c0_14, %c0_15], %37 {strides = array<i32>} : memref<1x4x2x128xf32, #tpu.memory_space<vmem>>, vector<1x4x2x128xf32>,
    %c0_16 = arith.constant 0 : index
    %c0_17 = arith.constant 0 : index
    %c0_18 = arith.constant 0 : index
    %c0_19 = arith.constant 0 : index
    %38 = vector.load %arg6[%c0_16, %c0_17, %c0_18, %c0_19] : memref<1x4x2x128xf32, #tpu.memory_space<vmem>>, vector<1x4x2x128xf32>
    %39 = vector.shape_cast %38 : vector<1x4x2x128xf32> to vector<4x2x128xf32>
    %40 = arith.addf %39, %31 : vector<4x2x128xf32>
    %c0_20 = arith.constant 0 : index
    %c0_21 = arith.constant 0 : index
    %c0_22 = arith.constant 0 : index
    %c0_23 = arith.constant 0 : index
    %41 = vector.load %arg6[%c0_20, %c0_21, %c0_22, %c0_23] : memref<1x4x2x128xf32, #tpu.memory_space<vmem>>, vector<1x4x2x128xf32>
    %42 = vector.shape_cast %41 : vector<1x4x2x128xf32> to vector<4x2x128xf32>
    %43 = vector.shape_cast %40 : vector<4x2x128xf32> to vector<1x4x2x128xf32>
    tpu.vector_store %arg6[%c0_20, %c0_21, %c0_22, %c0_23], %43 {strides = array<i32>} : memref<1x4x2x128xf32, #tpu.memory_space<vmem>>, vector<1x4x2x128xf32>,
    return
  }
  func.func @transform_0(%arg0: i32, %arg1: i32, %arg2: i32) -> (i32, i32, i32, i32) {
    %c1_i32 = arith.constant 1 : i32
    %0 = arith.muli %arg0, %c1_i32 : i32
    %1 = arith.addi %0, %arg1 : i32
    %c0_i32 = arith.constant 0 : i32
    %c0_i32_0 = arith.constant 0 : i32
    %c0_i32_1 = arith.constant 0 : i32
    return %1, %c0_i32, %arg2, %c0_i32_0 : i32, i32, i32, i32
  }
  func.func @transform_1(%arg0: i32, %arg1: i32, %arg2: i32) -> (i32, i32, i32) {
    %c1_i32 = arith.constant 1 : i32
    %0 = arith.muli %arg0, %c1_i32 : i32
    %1 = arith.addi %0, %arg1 : i32
    %c0_i32 = arith.constant 0 : i32
    %c0_i32_0 = arith.constant 0 : i32
    return %1, %arg2, %c0_i32 : i32, i32, i32
  }
  func.func @transform_2(%arg0: i32, %arg1: i32, %arg2: i32) -> (i32, i32, i32, i32) {
    %c0_i32 = arith.constant 0 : i32
    %c0_i32_0 = arith.constant 0 : i32
    %c0_i32_1 = arith.constant 0 : i32
    %c0_i32_2 = arith.constant 0 : i32
    return %arg0, %c0_i32, %c0_i32_0, %c0_i32_1 : i32, i32, i32, i32
  }
  func.func @transform_3(%arg0: i32, %arg1: i32, %arg2: i32) -> (i32, i32, i32, i32) {
    %c0_i32 = arith.constant 0 : i32
    %c0_i32_0 = arith.constant 0 : i32
    %c0_i32_1 = arith.constant 0 : i32
    %c0_i32_2 = arith.constant 0 : i32
    return %arg0, %c0_i32, %c0_i32_0, %c0_i32_1 : i32, i32, i32, i32
  }
}

</mosaic_0001>

<bundles_post_ra>
// kernel: tpu_custom_call.1
= control target key start
LH: loop header
LB: loop body
LE: loop exit
PB: predicated region body
PF: predicated region fallthrough
CT: control target
= control target key end

     0   :  { %9 = vsyncpa [#allocation3], 0  ;;  %s1149_s0 = inlined_call_operand.hbm [shape: f32[2,4,2,128], index: 0, kind: input, shape index: {}]   ;;  %s1150_s1 = inlined_call_operand.hbm [shape: s32[2,2,128], index: 1, kind: input, shape index: {}]   ;;  %s1151_s2 = inlined_call_operand.hbm [shape: f32[2,4,2,128], index: 2, kind: output, shape index: {0}]   ;;  %s1152_s3 = inlined_call_operand.hbm [shape: f32[2,4,2,128], index: 3, kind: output, shape index: {1}]  }
   0x1   :  { %11 = vsyncpa [#allocation3 + $0x1], 0 }
   0x2   :  { %12 = vsyncpa [#allocation6], 0 }
   0x3   :  { %14 = vsyncpa [#allocation6 + $0x1], 0 }
   0x4   :  { %15 = vsyncpa [#allocation4], 0 }
   0x5   :  { %17 = vsyncpa [#allocation4 + $0x1], 0 }
   0x6   :  { %18 = vsyncpa [#allocation9], 0 }
   0x7   :  { %20 = vsyncpa [#allocation9 + $0x1], 0  ;;  %s843_s12 = smov 0   ;;  %s845_s13 = smov 0  }
   0x8   :  { %s847_s14 = smov 0   ;;  %s849_s15 = smov 0  }
   0x9   :  { %s851_s16 = smov 0   ;;  %s853_s17 = smov 0  }
   0xa LB: > { %s527_s18 = sadd.s32 4294967295, %s812_s17   ;;  %s528_s19 = sadd.s32 4294967294, %s812_s17   ;;  %s812_s17 = sphi %s853_s17, %s26_s17   ;;  %s808_s16 = sphi %s851_s16, %s1171_s16   ;;  %s804_s15 = sphi %s849_s15, %s1170_s15   ;;  %s800_s14 = sphi %s847_s14, %s1169_s14   ;;  %s796_s13 = sphi %s845_s13, %s1168_s13   ;;  %s792_s12 = sphi %s843_s12, %s1167_s12  }
   0xb   : > { %s45_s20 = sadd.s32 1, %s808_s16  ;;  %s56_s21 = sadd.s32 1, %s800_s14 }
   0xc   : > { %p47_p0 = scmp.ge.s32.totalorder %s45_s20, 2  ;;  %p63_p1 = scmp.ne.s32.totalorder %s800_s14, %s796_s13 }
   0xd   : > { %p64_p2 = scmp.eq.s32.totalorder %s812_s17, 0  ;;  %p69_p3 = scmp.ne.s32.totalorder %s796_s13, %s792_s12 }
   0xe   : > { %s1173_s20 = smov (%p47_p0, %s45_s20), 0  ;;  %p70_p5 = scmp.eq.s32.totalorder %s527_s18, 0 }
   0xf   : > { %p884_p4 = por %p64_p2, %p63_p1  ;;  %s51_s23 = ssub.s32 %s808_s16, %s1173_s20 }
  0x10   : > { %p123_p6 = scmp.eq.s32.totalorder %s527_s18, 1  ;;  %p54_p7 = scmp.eq.s32.totalorder %s51_s23, 0 }
  0x11   : > { %p890_p8 = por %p70_p5, %p69_p3  ;;  %p129_p10 = scmp.eq.s32.totalorder %s528_s19, 1 }
  0x12   : > { %p894_p9 = por %p123_p6, %p63_p1  ;;  %p579_p13 = scmp.lt.s32.totalorder %s812_s17, 2 }
  0x13   : > { %s1156_s24 = scalar_select %p890_p8, 1, 0 }
  0x14   : > { %s1157_s25 = scalar_select %p894_p9, 1, 0 }
  0x15   : > { %s899_s26 = scalar_select %p54_p7, %s800_s14, %s56_s21  }
  0x16   : > { %p901_p11 = por %p129_p10, %p69_p3  ;;  %s908_s28 = sand.u32 1, %s800_s14  }
  0x17   : > { %s531_s29 = sshll.u32 %s908_s28, 3  ;;  %s554_s30 = sshll.u32 %s808_s16, 7 }
  0x18   : > { %s1158_s27 = scalar_select %p901_p11, 1, 0 }
  0x19   : > { %s915_s6 = scalar_lea.hbm %s1149_s0, %s554_s30  ;;  %s179_s7 = scalar_lea.vmem [#allocation2], %s531_s29 }
  0x1a   : > { %s188_s8 = sshll.u32 %s179_s7, 4  ;;  %p921_p0 = pnand %p579_p13, %p884_p4  ;;  %s917_s8 = int_to_ptr.vmem [resolvable:$true] %s188_s8 }
  0x1b   : > { %s176_s10 = scalar_lea.sflag [#allocation3], %s908_s28  ;;  %s634_s11 = scalar_lea.hbm %s915_s6, 128 }
  0x1c   : > { %p635_p2 = scmp.ne.s32.totalorder %s915_s6, %s634_s11  ;;  %p636_p3 = pneg %p921_p0 }
  0x1d   : > { %s639_s21 = scalar_lea.hbm %s1149_s0, 256  ;;  %p640_p4 = scmp.lt.u32.totalorder %s915_s6, %s1149_s0 }
  0x1e   : > { %p637_p5 = pnand %p636_p3, %p635_p2  ;;  %p641_p7 = scmp.lt.u32.totalorder %s639_s21, %s634_s11 }
  0x1f   : > { %p643_p13 = scmp.lt.u32.totalorder %s634_s11, %s915_s6 }
  0x20   : > { %p638_p6 = pneg %p637_p5  ;;  %p642_p10 = por %p641_p7, %p640_p4 }
  0x22   : > { %p644_p12 = por %p643_p13, %p642_p10 }
  0x24   : > { %p645_p1 = pnand %p644_p12, %p638_p6 }
  0x26   : > { %648 = shalt.err (!%p645_p1)
}
  0x27   : > { %s649_s29 = scalar_lea.vmem %s917_s8, 128  ;;  %s814_s30 = smov [#allocation2]  }
  0x28   : > { %p650_p2 = scmp.ne.s32.totalorder %s917_s8, %s649_s29  ;;  %s654_s4 = sshll.u32 %s814_s30, 4  ;;  %s655_s4 = int_to_ptr.vmem [resolvable:$false] %s654_s4 }
  0x29   : > { %s656_s5 = scalar_lea.vmem %s655_s4, 256  ;;  %p657_p9 = scmp.lt.s32.totalorder %s917_s8, %s655_s4 }
  0x2a   : > { %p652_p5 = pnand %p650_p2, %p636_p3  ;;  %p658_p4 = scmp.lt.s32.totalorder %s656_s5, %s649_s29 }
  0x2c   : > { %p653_p11 = pneg %p652_p5  ;;  %p659_p7 = por %p658_p4, %p657_p9 }
  0x2e   : > { %p660_p10 = pnand %p659_p7, %p653_p11 }
  0x30   : > { %663 = shalt.err (!%p660_p10)
}
  0x31   : > { %s815_s7 = smov 32   ;;  %s816_s11 = smov 2  }
  0x32   : > { %568 = dma.hbm_to_vmem [thread:$0]  (!%p921_p0), %s915_s6, 128, %s917_s8, %s176_s10, %s815_s7, %s815_s7, %s816_s11  }
  0x33   : > { %p216_p12 = scmp.lt.s32.totalorder %s812_s17, 3  ;;  %s534_s18 = sshll.u32 %s908_s28, 1 }
  0x34   : > { %s535_s19 = sshll.u32 %s808_s16, 5  ;;  %p1160_p9 = scmp.ge.s32.totalorder %s812_s17, 1 }
  0x35   : > { %s966_s29 = scalar_lea.hbm %s1150_s1, %s535_s19  ;;  %s202_s30 = scalar_lea.vmem [#allocation5], %s534_s18 }
  0x36   : > { %p959_p11 = pnand %p1160_p9, %p216_p12  ;;  %s211_s4 = sshll.u32 %s202_s30, 4  ;;  %s212_s4 = int_to_ptr.vmem [resolvable:$true] %s211_s4 }
  0x37   : > { %s199_s6 = scalar_lea.sflag [#allocation6], %s908_s28  ;;  %s664_s8 = scalar_lea.hbm %s966_s29, 32 }
  0x38   : > { %s1161_s21 = scalar_select %p959_p11, 1, 0 }
  0x39   : > { %p665_p1 = scmp.ne.s32.totalorder %s966_s29, %s664_s8  ;;  %s669_s7 = scalar_lea.hbm %s1150_s1, 64 }
  0x3a   : > { %p670_p2 = scmp.lt.u32.totalorder %s966_s29, %s1150_s1  ;;  %p671_p5 = scmp.lt.u32.totalorder %s669_s7, %s664_s8 }
  0x3b   : > { %p667_p6 = pnand %p665_p1, %p636_p3  ;;  %p673_p7 = scmp.lt.u32.totalorder %s664_s8, %s966_s29 }
  0x3c   : > { %p672_p4 = por %p671_p5, %p670_p2 }
  0x3d   : > { %p668_p13 = pneg %p667_p6 }
  0x3e   : > { %p674_p10 = por %p673_p7, %p672_p4 }
  0x40   : > { %p675_p12 = pnand %p674_p10, %p668_p13 }
  0x42   : > { %678 = shalt.err (!%p675_p12)
}
  0x43   : > { %s679_s28 = scalar_lea.vmem %s212_s4, 32  ;;  %s817_s18 = smov [#allocation5]  }
  0x44   : > { %p680_p9 = scmp.ne.s32.totalorder %s212_s4, %s679_s28  ;;  %s684_s22 = sshll.u32 %s817_s18, 4  ;;  %s685_s22 = int_to_ptr.vmem [resolvable:$false] %s684_s22 }
  0x45   : > { %s686_s23 = scalar_lea.vmem %s685_s22, 64  ;;  %p687_p8 = scmp.lt.s32.totalorder %s212_s4, %s685_s22 }
  0x46   : > { %p682_p1 = pnand %p680_p9, %p636_p3  ;;  %p688_p11 = scmp.lt.s32.totalorder %s686_s23, %s679_s28 }
  0x48   : > { %p683_p6 = pneg %p682_p1  ;;  %p689_p2 = por %p688_p11, %p687_p8 }
  0x4a   : > { %p690_p5 = pnand %p689_p2, %p683_p6 }
  0x4c   : > { %693 = shalt.err (!%p690_p5)
}
  0x4d   : > { %571 = dma.hbm_to_vmem [thread:$0]  (!%p921_p0), %s966_s29, 32, %s212_s4, %s199_s6  }
  0x4e   : > { %p1162_p13 = scmp.ne.s32.totalorder %s1161_s21, 0 }
  0x4f   : > { %s991_s30 = sand.u32 (!%p1162_p13), 1, %s796_s13   ;;  %p1163_p8 = scmp.ne.s32.totalorder (!%p1162_p13), %s1156_s24, 0 }
  0x50   : > { %220 = sbr.rel (%p1162_p13) target bundleno = 146 (0x92), region = 28  ;;  %s537_s8 = sshll.u32 (!%p1162_p13), %s991_s30, 3 }
  0x51   : > { %s223_s10 = scalar_lea.sflag (!%p1162_p13), [#allocation3], %s991_s30  ;;  %s995_s5 = scalar_lea.vmem (!%p1162_p13), [#allocation2], %s537_s8 }
  0x57   : > { %775 = dma.done.wait (%p1163_p8), %s223_s10, 128  }
  0x58   : > { %777 = vsyncadd (%p1163_p8), %s223_s10, 4294967168  ;;  %s538_s9 = sshll.u32 %s991_s30, 1  ;;  %s232_s21 = scalar_lea.sflag [#allocation6], %s991_s30 }
  0x59   : > { %s235_s29 = scalar_lea.vmem [#allocation5], %s538_s9 }
  0x5a   : > { %779 = dma.done.wait (%p1163_p8), %s232_s21, 32  }
  0x5b   : > { %781 = vsyncadd (%p1163_p8), %s232_s21, 4294967264  ;;  %s1007_s4 = scalar_lea.vmem [#allocation7], %s537_s8  ;;  %v818_v0 = vmov 0.0   ;;  %s1013_s6 = scalar_lea.vmem [#allocation8], %s537_s8  ;;  %v284_v1 = vld [vmem:[%s995_s5] sm:$0x3] }
  0x5c   : > { %276 = vst [vmem:[%s1007_s4] sm:$0x3] %v818_v0  ;;  %277 = vst [vmem:[%s1007_s4 + $0x2] sm:$0x3] %v818_v0  ;;  %s555_s24 = sshll.u32 %s804_s15, 7  ;;  %s367_s7 = sshll.u32 %s1007_s4, 4  ;;  %s1049_s7 = int_to_ptr.vmem [resolvable:$true] %s367_s7 }
  0x5d   : > { %278 = vst [vmem:[%s1007_s4 + $0x4] sm:$0x3] %v818_v0  ;;  %279 = vst [vmem:[%s1007_s4 + $0x6] sm:$0x3] %v818_v0  ;;  %v288_v2 = vld [vmem:[%s235_s29] sm:$0x3]  ;;  %s1045_s18 = scalar_lea.hbm %s1151_s2, %s555_s24 }
  0x5e   : > { %280 = vst [vmem:[%s1013_s6] sm:$0x3] %v818_v0  ;;  %281 = vst [vmem:[%s1013_s6 + $0x2] sm:$0x3] %v818_v0  ;;  %v285_v3 = vld [vmem:[%s995_s5 + $0x2] sm:$0x3]  ;;  %vm289_vm0 = vcmp.eq.s32.totalorder %v288_v2, 0 }
  0x5f   : > { %282 = vst [vmem:[%s1013_s6 + $0x4] sm:$0x3] %v818_v0  ;;  %283 = vst [vmem:[%s1013_s6 + $0x6] sm:$0x3] %v818_v0  ;;  %vm293_vm1 = vcmp.ne.s32.totalorder %v288_v2, 4294967196  ;;  %vm290_vm2 = vcmp.eq.s32.totalorder %v288_v2, 1 }
  0x60   : > { %vm291_vm3 = vcmp.eq.s32.totalorder %v288_v2, 2  ;;  %v541_v5 = vsel %vm293_vm1, 1.0, %v818_v0  ;;  %v296_v6 = vsel %vm289_vm0, %v284_v1, 0.0  ;;  %v297_v7 = vsel %vm290_vm2, %v285_v3, 0.0  ;;  %v286_v13 = vld [vmem:[%s995_s5 + $0x4] sm:$0x3] }
  0x61   : > { %vm292_vm4 = vcmp.eq.s32.totalorder %v288_v2, 3  ;;  %v316_v9 = vmul.f32 %v541_v5, %v284_v1  ;;  %v317_v11 = vmul.f32 %v541_v5, %v285_v3  ;;  %v287_v15 = vld [vmem:[%s995_s5 + $0x6] sm:$0x3]  ;;  %v298_v16 = vsel %vm291_vm3, %v286_v13, 0.0  ;;  %s383_s11 = sshll.u32 %s1013_s6, 4  ;;  %s349_s22 = scalar_lea.sflag [#allocation4], %s991_s30  ;;  %s1093_s11 = int_to_ptr.vmem [resolvable:$true] %s383_s11 }
  0x62   : > { %v318_v17 = vmul.f32 %v541_v5, %v286_v13  ;;  %v299_v18 = vsel %vm292_vm4, %v287_v15, 0.0  ;;  %v319_v19 = vmul.f32 %v541_v5, %v287_v15  ;;  %v542_v23 = vsel %vm289_vm0, 1.0, %v818_v0  ;;  %s694_s23 = scalar_lea.vmem %s1049_s7, 128  ;;  %p1164_p3 = scmp.ne.s32.totalorder %s1157_s25, 0 }
  0x63   : > { %v324_v4 = vld [vmem:[%s1007_s4] sm:$0x3]  ;;  %v325_v8 = vld [vmem:[%s1007_s4 + $0x2] sm:$0x3]  ;;  %v543_v25 = vsel %vm290_vm2, 1.0, %v818_v0  ;;  %v320_v27 = vadd.f32 %v542_v23, %v316_v9  ;;  %v544_v29 = vsel %vm291_vm3, 1.0, %v818_v0  ;;  %p695_p0 = scmp.ne.s32.totalorder %s1049_s7, %s694_s23 }
  0x64   : > { %v328_v10 = vadd.f32 %v324_v4, %v296_v6  ;;  %v329_v12 = vadd.f32 %v325_v8, %v297_v7  ;;  %v326_v14 = vld [vmem:[%s1007_s4 + $0x4] sm:$0x3]  ;;  %v327_v20 = vld [vmem:[%s1007_s4 + $0x6] sm:$0x3]  ;;  %v321_v28 = vadd.f32 %v543_v25, %v317_v11  ;;  %v545_v31 = vsel %vm292_vm4, 1.0, %v818_v0  ;;  %s819_s8 = smov [#allocation7]  }
  0x65   : > { %v330_v21 = vadd.f32 %v326_v14, %v298_v16  ;;  %v331_v22 = vadd.f32 %v327_v20, %v299_v18  ;;  %v336_v24 = vld [vmem:[%s1013_s6] sm:$0x3]  ;;  %v337_v26 = vld [vmem:[%s1013_s6 + $0x2] sm:$0x3]  ;;  %v322_v33 = vadd.f32 %v544_v29, %v318_v17  ;;  %v323_v34 = vadd.f32 %v545_v31, %v319_v19  ;;  %p696_p11 = pnand %p695_p0, %p1164_p3  ;;  %s698_s10 = sshll.u32 %s819_s8, 4  ;;  %s699_s10 = int_to_ptr.vmem [resolvable:$false] %s698_s10 }
  0x66   : > { %332 = vst [vmem:[%s1007_s4] sm:$0x3] %v328_v10  ;;  %333 = vst [vmem:[%s1007_s4 + $0x2] sm:$0x3] %v329_v12  ;;  %v338_v30 = vld [vmem:[%s1013_s6 + $0x4] sm:$0x3]  ;;  %v340_v35 = vadd.f32 %v336_v24, %v320_v27  ;;  %v341_v36 = vadd.f32 %v337_v26, %v321_v28  ;;  %s700_s5 = scalar_lea.vmem %s699_s10, 256  ;;  %p701_p7 = scmp.lt.s32.totalorder %s1049_s7, %s699_s10 }
  0x67   : > { %v339_v32 = vld [vmem:[%s1013_s6 + $0x6] sm:$0x3]  ;;  %334 = vst [vmem:[%s1007_s4 + $0x4] sm:$0x3] %v330_v21  ;;  %335 = vst [vmem:[%s1007_s4 + $0x6] sm:$0x3] %v331_v22  ;;  %p697_p4 = pneg %p696_p11  ;;  %p702_p10 = scmp.lt.s32.totalorder %s700_s5, %s694_s23 }
  0x69   : > { %p703_p12 = por %p702_p10, %p701_p7 }
  0x6b   : > { %p704_p9 = pnand %p703_p12, %p697_p4 }
  0x6d   : > { %707 = shalt.err (!%p704_p9)
}
  0x6e   : > { %s708_s9 = scalar_lea.hbm %s1045_s18, 128  ;;  %s712_s4 = scalar_lea.hbm %s1151_s2, 256 }
  0x6f   : > { %p709_p1 = scmp.ne.s32.totalorder %s1045_s18, %s708_s9  ;;  %p713_p5 = scmp.lt.u32.totalorder %s1045_s18, %s1151_s2 }
  0x70   : > { %p714_p13 = scmp.lt.u32.totalorder %s712_s4, %s708_s9  ;;  %p716_p0 = scmp.lt.u32.totalorder %s708_s9, %s1045_s18 }
  0x71   : > { %p710_p6 = pnand %p709_p1, %p1164_p3 }
  0x72   : > { %p715_p8 = por %p714_p13, %p713_p5 }
  0x73   : > { %p711_p2 = pneg %p710_p6 }
  0x74   : > { %p717_p11 = por %p716_p0, %p715_p8 }
  0x76   : > { %p718_p4 = pnand %p717_p11, %p711_p2 }
  0x78   : > { %721 = shalt.err (!%p718_p4)
}
  0x79   : > { %s820_s23 = smov 32   ;;  %s821_s8 = smov 2   ;;  %v342_v37 = vadd.f32 %v338_v30, %v322_v33  ;;  %v343_v38 = vadd.f32 %v339_v32, %v323_v34  ;;  %344 = vst [vmem:[%s1013_s6] sm:$0x3] %v340_v35  ;;  %345 = vst [vmem:[%s1013_s6 + $0x2] sm:$0x3] %v341_v36 }
  0x7a   : > { %561 = dma.vmem_to_hbm [thread:$0]  (%p1164_p3), %s1049_s7, 128, %s1045_s18, %s349_s22, %s820_s23, %s820_s23, %s821_s8  }
  0x7b   : > { %s1089_s9 = scalar_lea.hbm %s1152_s3, %s555_s24  ;;  %346 = vst [vmem:[%s1013_s6 + $0x4] sm:$0x3] %v342_v37  ;;  %347 = vst [vmem:[%s1013_s6 + $0x6] sm:$0x3] %v343_v38  ;;  %s354_s21 = scalar_lea.sflag [#allocation9], %s991_s30 }
  0x7c   : > { %s722_s7 = scalar_lea.vmem %s1093_s11, 128  ;;  %s822_s15 = smov [#allocation8]  }
  0x7d   : > { %p723_p7 = scmp.ne.s32.totalorder %s1093_s11, %s722_s7  ;;  %s726_s18 = sshll.u32 %s822_s15, 4  ;;  %s727_s18 = int_to_ptr.vmem [resolvable:$false] %s726_s18 }
  0x7e   : > { %s728_s24 = scalar_lea.vmem %s727_s18, 256  ;;  %p729_p9 = scmp.lt.s32.totalorder %s1093_s11, %s727_s18 }
  0x7f   : > { %p724_p10 = pnand %p723_p7, %p1164_p3  ;;  %p730_p1 = scmp.lt.s32.totalorder %s728_s24, %s722_s7 }
  0x81   : > { %p725_p12 = pneg %p724_p10  ;;  %p731_p6 = por %p730_p1, %p729_p9 }
  0x83   : > { %p732_p2 = pnand %p731_p6, %p725_p12 }
  0x85   : > { %735 = shalt.err (!%p732_p2)
}
  0x86   : > { %s736_s6 = scalar_lea.hbm %s1089_s9, 128  ;;  %s740_s4 = scalar_lea.hbm %s1152_s3, 256 }
  0x87   : > { %p737_p5 = scmp.ne.s32.totalorder %s1089_s9, %s736_s6  ;;  %p741_p0 = scmp.lt.u32.totalorder %s1089_s9, %s1152_s3 }
  0x88   : > { %p742_p11 = scmp.lt.u32.totalorder %s740_s4, %s736_s6  ;;  %p744_p7 = scmp.lt.u32.totalorder %s736_s6, %s1089_s9 }
  0x89   : > { %p738_p13 = pnand %p737_p5, %p1164_p3 }
  0x8a   : > { %p743_p4 = por %p742_p11, %p741_p0 }
  0x8b   : > { %p739_p8 = pneg %p738_p13 }
  0x8c   : > { %p745_p10 = por %p744_p7, %p743_p4 }
  0x8e   : > { %p746_p12 = pnand %p745_p10, %p739_p8 }
  0x90   : > { %749 = shalt.err (!%p746_p12)
}
  0x91   : > { %562 = dma.vmem_to_hbm [thread:$0]  (%p1164_p3), %s1093_s11, 128, %s1089_s9, %s354_s21, %s820_s23, %s820_s23, %s821_s8  }
  0x92 PF: > { %s398_s10 = sand.u32 1, %s792_s12   ;;  %p1165_p9 = scmp.ne.s32.totalorder %s1158_s27, 0 }
  0x93   : > { %p1166_p1 = scmp.ge.s32.totalorder %s812_s17, 2  ;;  %s399_s5 = scalar_lea.sflag [#allocation4], %s398_s10 }
  0x95   : > { %p573_p6 = pnand %p1166_p1, %p1165_p9 }
  0x97   : > { %783 = dma.done.wait (!%p573_p6), %s399_s5, 128  }
  0x98   : > { %785 = vsyncadd (!%p573_p6), %s399_s5, 4294967168  ;;  %s408_s25 = scalar_lea.sflag [#allocation9], %s398_s10 }
  0x99   : > { %787 = dma.done.wait (!%p573_p6), %s408_s25, 128  }
  0x9a   : > { %789 = vsyncadd (!%p573_p6), %s408_s25, 4294967168  ;;  %s26_s17 = sadd.s32 1, %s812_s17   ;;  %s1167_s12 = smov %s796_s13 }
  0x9b   : > { %p23_p2 = scmp.ge.s32.totalorder %s26_s17, 4   ;;  %s1168_s13 = smov %s800_s14 }
  0x9c   : > { %s1169_s14 = smov %s899_s26  ;;  %s1170_s15 = smov %s808_s16 }
  0x9d   : > { %s1171_s16 = smov %s1173_s20  ;;  %25 = sbr.rel (!%p23_p2) target bundleno = 10 (0xa), region = 107 }
  0xa4   :  { %413 = vsyncpa [#allocation3], 1 }
  0xa5   :  { %415 = vsyncpa [#allocation3 + $0x1], 1 }
  0xa6   :  { %416 = vsyncpa [#allocation6], 1 }
  0xa7   :  { %418 = vsyncpa [#allocation6 + $0x1], 1 }
  0xa8   :  { %419 = vsyncpa [#allocation4], 1 }
  0xa9   :  { %421 = vsyncpa [#allocation4 + $0x1], 1 }
  0xaa   :  { %422 = vsyncpa [#allocation9], 1 }
  0xab   :  { %424 = vsyncpa [#allocation9 + $0x1], 1 }

</bundles_post_ra>
